<compile_context>
chip_gen: v7x
topology: tpu7x:2x2x1
jax: 0.10.0
libtpu: 0.0.40
codegen_flags: <defaults>
</compile_context>

<pallas_src>
import jax
import jax.numpy as jnp
from jax.experimental import pallas as pl
from jax.experimental.pallas import tpu as pltpu


def mixer_layer_kernel(x_ref, w_ref, b_ref, o_ref, acc_ref):
    # x_ref:   (T, N_blk)   activation slab (tokens x folded batch*dim lanes), read at l==0
    # w_ref:   (1, T, T)    this layer's (tril(W) + I)  -- residual folded into W
    # b_ref:   (1, T, 1)    this layer's bias (broadcasts over the lane axis)
    # o_ref:   (T, N_blk)   written only on the last depth step
    # acc_ref: (T, N_blk)   f32 VMEM carry, resident across the depth axis
    l = pl.program_id(1)

    @pl.when(l == 0)
    def _():
        acc_ref[...] = x_ref[...].astype(jnp.float32)

    # (tril(W)+I) @ x on the MXU with f32 accumulation; bias add on the VPU.
    acc_ref[...] = (
        jnp.dot(w_ref[0], acc_ref[...], preferred_element_type=jnp.float32) + b_ref[0]
    )

    @pl.when(l == pl.num_programs(1) - 1)
    def _():
        o_ref[...] = acc_ref[...].astype(o_ref.dtype)  # single lane-dense store


def _choose_n_block(n_pad):
    # n_pad is a multiple of 128. Prefer wide lane blocks (>=256 fills the v6e/v7x
    # 256-wide MXU) while keeping >=2 grid steps on the "parallel" axis (megacore,
    # pipelining). Never go below 128 lanes (masked vst penalty).
    for cand in (1024, 512, 256):
        if n_pad % cand == 0 and n_pad // cand >= 2:
            return cand
    for cand in (512, 256, 128):
        if n_pad % cand == 0:
            return cand
    return n_pad


def mixer_stack(x_tn, w_stack, b_stack):
    # x_tn: (T, N) with N = B*D; w_stack: (DEPTH, T, T) already tril-masked + I;
    # b_stack: (DEPTH, T, 1).
    T, n = x_tn.shape
    depth = w_stack.shape[0]

    # Pad the folded batch*dim axis up to a multiple of 128 so every store is a
    # full, unmasked lane-dense vst.
    n_pad = ((n + 127) // 128) * 128
    if n_pad != n:
        x_tn = jnp.pad(x_tn, ((0, 0), (0, n_pad - n)))

    n_blk = _choose_n_block(n_pad)
    grid = (n_pad // n_blk, depth)

    cost = pl.CostEstimate(
        flops=2 * depth * T * T * n_pad + depth * T * n_pad,
        transcendentals=0,
        bytes_accessed=4 * (2 * T * n_pad + depth * T * T + depth * T),
    )

    y = pl.pallas_call(
        mixer_layer_kernel,
        out_shape=jax.ShapeDtypeStruct((T, n_pad), x_tn.dtype),
        grid_spec=pltpu.PrefetchScalarGridSpec(
            num_scalar_prefetch=0,
            grid=grid,
            in_specs=[
                # Activation block: constant index across the depth axis -> DMA'd
                # once per n step, kept resident while layers stream through.
                pl.BlockSpec((T, n_blk), lambda ni, l: (0, ni)),
                # One layer of weights / bias per depth step -> streamed and
                # double-buffered by the auto-pipeline (bounds VMEM to ~2 layers).
                pl.BlockSpec((1, T, T), lambda ni, l: (l, 0, 0)),
                pl.BlockSpec((1, T, 1), lambda ni, l: (l, 0, 0)),
            ],
            out_specs=pl.BlockSpec((T, n_blk), lambda ni, l: (0, ni)),
            scratch_shapes=[pltpu.VMEM((T, n_blk), jnp.float32)],
        ),
        compiler_params=pltpu.CompilerParams(
            dimension_semantics=("parallel", "arbitrary"),
            # Footprint today is <1 MiB; pinned so larger n_blk/T/DEPTH don't trip
            # the 16/32 MiB scoped defaults.
            vmem_limit_bytes=32 * 1024 * 1024,
        ),
        cost_estimate=cost,
    )(x_tn, w_stack, b_stack)

    return y[:, :n] if n_pad != n else y


def linear_mixer_forward(input_ids, wte, block_weights, block_biases):
    B, T = input_ids.shape
    D = wte.shape[1]

    # Gather embeddings directly in (T, B, D) token-major order so folding to
    # (T, B*D) is a free contiguous reshape (no activation-sized input transpose).
    x_tn = jnp.take(wte, input_ids.T, axis=0).reshape(T, B * D)

    # Fold the causal mask AND the residual into the weights once (static):
    #   (tril(W) + I) @ x == tril(W) @ x + x
    eye = jnp.eye(T, dtype=jnp.float32)
    w_stack = jnp.stack([jnp.tril(w) + eye for w in block_weights])  # (DEPTH, T, T)
    b_stack = jnp.stack(block_biases)                                # (DEPTH, T, 1)

    y_tn = mixer_stack(x_tn, w_stack, b_stack)

    # Module contract returns (B, T, D); this is the only remaining activation copy.
    # Fuse/defer it into the downstream consumer (e.g. lm_head) in a full model.
    return y_tn.reshape(T, B, D).transpose(1, 0, 2)
    # TODO(synk): labels branch (lm_head + shifted cross-entropy) not exercised
    # when labels is None; omitted here.


def reference_forward(input_ids, wte, block_weights, block_biases):
    x = jnp.take(wte, input_ids, axis=0)  # (B, T, D)
    for w, b in zip(block_weights, block_biases):
        wm = jnp.tril(w)
        x = jnp.einsum("ij,bjd->bid", wm, x) + b.reshape(1, -1, 1) + x
    return x


if __name__ == "__main__":
    B = 16           # batch: folds into the matmul N dim -> B*D = 512 (2 blocks of 256 lanes)
    T = 128          # tokenized_length (module hard-codes 128)
    D = 32           # embedding dim
    DEPTH = 2
    N_VOCAB = 256

    key = jax.random.PRNGKey(0)
    k_ids, k_wte, *k_blocks = jax.random.split(key, 2 + 2 * DEPTH)

    input_ids = jax.random.randint(k_ids, (B, T), 0, N_VOCAB, dtype=jnp.int32)
    wte = jax.random.normal(k_wte, (N_VOCAB, D), dtype=jnp.float32) * 0.02

    block_weights = []
    block_biases = []
    for i in range(DEPTH):
        kw, kb = k_blocks[2 * i], k_blocks[2 * i + 1]
        # nn.Conv1d(length, length, 1).weight has shape (T, T, 1) -> squeeze to (T, T)
        block_weights.append(jax.random.normal(kw, (T, T), dtype=jnp.float32) * (1.0 / T))
        block_biases.append(jax.random.normal(kb, (T, 1), dtype=jnp.float32) * 0.01)

    fwd = jax.jit(linear_mixer_forward)
    out = jax.block_until_ready(fwd(input_ids, wte, block_weights, block_biases))

    ref = reference_forward(input_ids, wte, block_weights, block_biases)
    assert out.shape == (B, T, D)
    assert jnp.allclose(out, ref, atol=1e-4, rtol=1e-4), "mismatch vs JAX reference"

    print("KERNEL_OK")
</pallas_src>

<mosaic_0001>
module attributes {stable_mosaic.version = 11 : i64} {
  func.func @mixer_layer_kernel(%arg0: i32, %arg1: i32, %arg2: memref<128x256xf32, #tpu.memory_space<vmem>>, %arg3: memref<1x128x128xf32, #tpu.memory_space<vmem>>, %arg4: memref<1x128x1xf32, #tpu.memory_space<vmem>>, %arg5: memref<128x256xf32, #tpu.memory_space<vmem>>, %arg6: memref<128x256xf32, #tpu.memory_space<vmem>>) attributes {dimension_semantics = [#tpu.dimension_semantics<parallel>, #tpu.dimension_semantics<arbitrary>], iteration_bounds = array<i64: 2, 2>, scalar_prefetch = 0 : i64, scratch_operands = 1 : i64, tpu.core_type = #tpu.core_type<tc>, window_params = [{transform_indices = @transform_0, window_bounds = array<i64: 128, 256>}, {transform_indices = @transform_1, window_bounds = array<i64: 1, 128, 128>}, {transform_indices = @transform_2, window_bounds = array<i64: 1, 128, 1>}, {transform_indices = @transform_3, window_bounds = array<i64: 128, 256>}]} {
    %c0_i32 = arith.constant 0 : i32
    %0 = arith.cmpi eq, %arg1, %c0_i32 : i32
    %1 = arith.extui %0 : i1 to i32
    %c0_i32_0 = arith.constant 0 : i32
    %2 = arith.cmpi ne, %1, %c0_i32_0 : i32
    scf.if %2 {
      %c0_11 = arith.constant 0 : index
      %c0_12 = arith.constant 0 : index
      %15 = vector.load %arg2[%c0_11, %c0_12] : memref<128x256xf32, #tpu.memory_space<vmem>>, vector<128x256xf32>
      %c0_13 = arith.constant 0 : index
      %c0_14 = arith.constant 0 : index
      %16 = vector.load %arg6[%c0_13, %c0_14] : memref<128x256xf32, #tpu.memory_space<vmem>>, vector<128x256xf32>
      tpu.vector_store %arg6[%c0_13, %c0_14], %15 {strides = array<i32>} : memref<128x256xf32, #tpu.memory_space<vmem>>, vector<128x256xf32>,
    } else {
    }
    %c0 = arith.constant 0 : index
    %c0_1 = arith.constant 0 : index
    %c0_2 = arith.constant 0 : index
    %3 = vector.load %arg3[%c0, %c0_1, %c0_2] : memref<1x128x128xf32, #tpu.memory_space<vmem>>, vector<1x128x128xf32>
    %4 = vector.shape_cast %3 : vector<1x128x128xf32> to vector<128x128xf32>
    %c0_3 = arith.constant 0 : index
    %c0_4 = arith.constant 0 : index
    %5 = vector.load %arg6[%c0_3, %c0_4] : memref<128x256xf32, #tpu.memory_space<vmem>>, vector<128x256xf32>
    %cst = arith.constant dense<0.000000e+00> : vector<128x256xf32>
    %6 = tpu.matmul %4, %5, %cst {dimension_numbers = #tpu.dot_dimension_numbers<[1], [0], [0], [1], [0, 0, 1, 1], [], []>} : vector<128x128xf32>, vector<128x256xf32>, vector<128x256xf32> -> vector<128x256xf32>
    %c0_5 = arith.constant 0 : index
    %c0_6 = arith.constant 0 : index
    %c0_7 = arith.constant 0 : index
    %7 = vector.load %arg4[%c0_5, %c0_6, %c0_7] : memref<1x128x1xf32, #tpu.memory_space<vmem>>, vector<1x128x1xf32>
    %8 = vector.shape_cast %7 : vector<1x128x1xf32> to vector<128x1xf32>
    %9 = vector.broadcast %8 : vector<128x1xf32> to vector<128x256xf32>
    %10 = arith.addf %6, %9 : vector<128x256xf32>
    %c0_8 = arith.constant 0 : index
    %c0_9 = arith.constant 0 : index
    %11 = vector.load %arg6[%c0_8, %c0_9] : memref<128x256xf32, #tpu.memory_space<vmem>>, vector<128x256xf32>
    tpu.vector_store %arg6[%c0_8, %c0_9], %10 {strides = array<i32>} : memref<128x256xf32, #tpu.memory_space<vmem>>, vector<128x256xf32>,
    %c1_i32 = arith.constant 1 : i32
    %12 = arith.cmpi eq, %arg1, %c1_i32 : i32
    %13 = arith.extui %12 : i1 to i32
    %c0_i32_10 = arith.constant 0 : i32
    %14 = arith.cmpi ne, %13, %c0_i32_10 : i32
    scf.if %14 {
      %c0_11 = arith.constant 0 : index
      %c0_12 = arith.constant 0 : index
      %15 = vector.load %arg6[%c0_11, %c0_12] : memref<128x256xf32, #tpu.memory_space<vmem>>, vector<128x256xf32>
      %c0_13 = arith.constant 0 : index
      %c0_14 = arith.constant 0 : index
      %16 = vector.load %arg5[%c0_13, %c0_14] : memref<128x256xf32, #tpu.memory_space<vmem>>, vector<128x256xf32>
      tpu.vector_store %arg5[%c0_13, %c0_14], %15 {strides = array<i32>} : memref<128x256xf32, #tpu.memory_space<vmem>>, vector<128x256xf32>,
    } else {
    }
    return
  }
  func.func @transform_0(%arg0: i32, %arg1: i32) -> (i32, i32) {
    %c0_i32 = arith.constant 0 : i32
    %c0_i32_0 = arith.constant 0 : i32
    return %c0_i32, %arg0 : i32, i32
  }
  func.func @transform_1(%arg0: i32, %arg1: i32) -> (i32, i32, i32) {
    %c0_i32 = arith.constant 0 : i32
    %c0_i32_0 = arith.constant 0 : i32
    %c0_i32_1 = arith.constant 0 : i32
    return %arg1, %c0_i32, %c0_i32_0 : i32, i32, i32
  }
  func.func @transform_2(%arg0: i32, %arg1: i32) -> (i32, i32, i32) {
    %c0_i32 = arith.constant 0 : i32
    %c0_i32_0 = arith.constant 0 : i32
    %c0_i32_1 = arith.constant 0 : i32
    return %arg1, %c0_i32, %c0_i32_0 : i32, i32, i32
  }
  func.func @transform_3(%arg0: i32, %arg1: i32) -> (i32, i32) {
    %c0_i32 = arith.constant 0 : i32
    %c0_i32_0 = arith.constant 0 : i32
    return %c0_i32, %arg0 : i32, i32
  }
}

</mosaic_0001>

<bundles_post_ra>
// kernel: linear_mixer_forward.1
= control target key start
LH: loop header
LB: loop body
LE: loop exit
PB: predicated region body
PF: predicated region fallthrough
CT: control target
= control target key end

     0   :  { %s1166_s12 = smov 0   ;;  %s1168_s13 = smov 0   ;;  %s1538_s0 = inlined_call_operand.vmem [shape: f32[128,512], index: 0, kind: input, shape index: {}]   ;;  %s1539_s1 = inlined_call_operand.vmem [shape: f32[2,128,128], index: 1, kind: input, shape index: {}]   ;;  %s1540_s2 = inlined_call_operand.vmem [shape: f32[2,128,1], index: 2, kind: input, shape index: {}]   ;;  %s1541_s3 = inlined_call_operand.vmem [shape: f32[128,512], index: 3, kind: output, shape index: {}]  }
   0x1   :  { %s1170_s14 = smov 0   ;;  %s1172_s15 = smov 0  }
   0x2   :  { %s1174_s16 = smov 0   ;;  %s1176_s17 = smov 0  }
   0x3   :  { %s1178_s18 = smov 0  }
   0x4 LB: > { %s22_s19 = sadd.s32 1, %s1134_s16  ;;  %s25_s20 = sadd.s32 1, %s1138_s17  ;;  %s1142_s18 = sphi %s1178_s18, %s13_s18   ;;  %s1138_s17 = sphi %s1176_s17, %s1548_s17   ;;  %s1134_s16 = sphi %s1174_s16, %s1547_s16   ;;  %s1130_s15 = sphi %s1172_s15, %s1546_s15   ;;  %s1126_s14 = sphi %s1170_s14, %s1545_s14   ;;  %s1122_s13 = sphi %s1168_s13, %s1544_s13   ;;  %s1118_s12 = sphi %s1166_s12, %s1543_s12  }
   0x5   : > { %p23_p0 = scmp.ge.s32.totalorder %s22_s19, 2  ;;  %s955_s21 = sadd.s32 4294967295, %s1142_s18  }
   0x6   : > { %p39_p1 = scmp.ne.s32.totalorder %s1122_s13, %s1118_s12  ;;  %p40_p2 = scmp.eq.s32.totalorder %s1142_s18, 0 }
   0x7   : > { %s1550_s19 = smov (%p23_p0, %s22_s19), 0  ;;  %s1552_s20 = smov (!%p23_p0, %s25_s20), %s1138_s17 }
   0x8   : > { %p121_p3 = scmp.eq.s32.totalorder %s955_s21, 3  ;;  %p27_p4 = scmp.ge.s32.totalorder %s1552_s20, 2 }
   0x9   : > { %p41_p5 = por %p40_p2, %p39_p1  ;;  %s32_s24 = sadd.s32 1, %s1122_s13 }
   0xa   : > { %p1210_p6 = por %p121_p3, %p39_p1  ;;  %s1554_s20 = smov (%p27_p4, %s1552_s20), 0 }
   0xb   : > { %s29_s23 = ssub.s32 %s1138_s17, %s1554_s20  ;;  %p958_p8 = scmp.ge.s32.totalorder %s1142_s18, 4 }
   0xc   : > { %p30_p7 = scmp.eq.s32.totalorder %s29_s23, 0 }
   0xd   : > { %143 = sbr.rel (%p958_p8) target bundleno = 40 (0x28), region = 16 }
   0xe   : > { %s1220_s25 = scalar_select %p30_p7, %s1122_s13, %s32_s24  }
  0x14   : > { %146 = sbr.rel (!%p41_p5) target bundleno = 40 (0x28), region = 20  ;;  %s148_s26 = sand.u32 (%p41_p5), 1, %s1122_s13  }
  0x15   : > { %s976_s27 = sshll.u32 (%p41_p5), %s1138_s17, 4  ;;  %s959_s28 = sshll.u32 (%p41_p5), %s148_s26, 8 }
  0x16   : > { %s1228_s4 = scalar_lea.vmem (%p41_p5), %s1538_s0, %s976_s27  ;;  %s1233_s5 = scalar_lea.vmem (%p41_p5), [#allocation3], %s959_s28 }
  0x17   : > { %v166_v0 = vld [vmem:[%s1228_s4] sm:$0xff] (%p41_p5)  ;;  %v168_v1 = vld [vmem:[%s1228_s4 + $0x8] sm:$0xff] (%p41_p5) }
  0x18   : > { %v170_v2 = vld [vmem:[%s1228_s4 + $0x20] sm:$0xff] (%p41_p5)  ;;  %167 = vst [vmem:[%s1233_s5] sm:$0xff] (%p41_p5), %v166_v0  ;;  %169 = vst [vmem:[%s1233_s5 + $0x8] sm:$0xff] (%p41_p5), %v168_v1  ;;  %v172_v3 = vld [vmem:[%s1228_s4 + $0x28] sm:$0xff] (%p41_p5) }
  0x19   : > { %171 = vst [vmem:[%s1233_s5 + $0x10] sm:$0xff] (%p41_p5), %v170_v2  ;;  %v174_v4 = vld [vmem:[%s1228_s4 + $0x40] sm:$0xff] (%p41_p5)  ;;  %v176_v5 = vld [vmem:[%s1228_s4 + $0x48] sm:$0xff] (%p41_p5)  ;;  %173 = vst [vmem:[%s1233_s5 + $0x18] sm:$0xff] (%p41_p5), %v172_v3 }
  0x1a   : > { %175 = vst [vmem:[%s1233_s5 + $0x20] sm:$0xff] (%p41_p5), %v174_v4  ;;  %177 = vst [vmem:[%s1233_s5 + $0x28] sm:$0xff] (%p41_p5), %v176_v5  ;;  %v178_v6 = vld [vmem:[%s1228_s4 + $0x60] sm:$0xff] (%p41_p5)  ;;  %v180_v7 = vld [vmem:[%s1228_s4 + $0x68] sm:$0xff] (%p41_p5) }
  0x1b   : > { %v182_v8 = vld [vmem:[%s1228_s4 + $0x80] sm:$0xff]  ;;  %179 = vst [vmem:[%s1233_s5 + $0x30] sm:$0xff] %v178_v6  ;;  %181 = vst [vmem:[%s1233_s5 + $0x38] sm:$0xff] %v180_v7  ;;  %v184_v9 = vld [vmem:[%s1228_s4 + $0x88] sm:$0xff] }
  0x1c   : > { %183 = vst [vmem:[%s1233_s5 + $0x40] sm:$0xff] %v182_v8  ;;  %v186_v10 = vld [vmem:[%s1228_s4 + $0xa0] sm:$0xff]  ;;  %v188_v11 = vld [vmem:[%s1228_s4 + $0xa8] sm:$0xff]  ;;  %185 = vst [vmem:[%s1233_s5 + $0x48] sm:$0xff] %v184_v9 }
  0x1d   : > { %187 = vst [vmem:[%s1233_s5 + $0x50] sm:$0xff] %v186_v10  ;;  %189 = vst [vmem:[%s1233_s5 + $0x58] sm:$0xff] %v188_v11  ;;  %v190_v12 = vld [vmem:[%s1228_s4 + $0xc0] sm:$0xff]  ;;  %v192_v13 = vld [vmem:[%s1228_s4 + $0xc8] sm:$0xff] }
  0x1e   : > { %v194_v14 = vld [vmem:[%s1228_s4 + $0xe0] sm:$0xff]  ;;  %191 = vst [vmem:[%s1233_s5 + $0x60] sm:$0xff] %v190_v12  ;;  %193 = vst [vmem:[%s1233_s5 + $0x68] sm:$0xff] %v192_v13  ;;  %v196_v15 = vld [vmem:[%s1228_s4 + $0xe8] sm:$0xff] }
  0x1f   : > { %195 = vst [vmem:[%s1233_s5 + $0x70] sm:$0xff] %v194_v14  ;;  %v198_v16 = vld [vmem:[%s1228_s4 + $0x100] sm:$0xff]  ;;  %v200_v17 = vld [vmem:[%s1228_s4 + $0x108] sm:$0xff]  ;;  %197 = vst [vmem:[%s1233_s5 + $0x78] sm:$0xff] %v196_v15 }
  0x20   : > { %199 = vst [vmem:[%s1233_s5 + $0x80] sm:$0xff] %v198_v16  ;;  %201 = vst [vmem:[%s1233_s5 + $0x88] sm:$0xff] %v200_v17  ;;  %v202_v18 = vld [vmem:[%s1228_s4 + $0x120] sm:$0xff]  ;;  %v204_v19 = vld [vmem:[%s1228_s4 + $0x128] sm:$0xff] }
  0x21   : > { %v206_v20 = vld [vmem:[%s1228_s4 + $0x140] sm:$0xff]  ;;  %203 = vst [vmem:[%s1233_s5 + $0x90] sm:$0xff] %v202_v18  ;;  %205 = vst [vmem:[%s1233_s5 + $0x98] sm:$0xff] %v204_v19  ;;  %v208_v21 = vld [vmem:[%s1228_s4 + $0x148] sm:$0xff] }
  0x22   : > { %207 = vst [vmem:[%s1233_s5 + $0xa0] sm:$0xff] %v206_v20  ;;  %v210_v22 = vld [vmem:[%s1228_s4 + $0x160] sm:$0xff]  ;;  %v212_v23 = vld [vmem:[%s1228_s4 + $0x168] sm:$0xff]  ;;  %209 = vst [vmem:[%s1233_s5 + $0xa8] sm:$0xff] %v208_v21 }
  0x23   : > { %211 = vst [vmem:[%s1233_s5 + $0xb0] sm:$0xff] %v210_v22  ;;  %213 = vst [vmem:[%s1233_s5 + $0xb8] sm:$0xff] %v212_v23  ;;  %v214_v24 = vld [vmem:[%s1228_s4 + $0x180] sm:$0xff]  ;;  %v216_v25 = vld [vmem:[%s1228_s4 + $0x188] sm:$0xff] }
  0x24   : > { %v218_v26 = vld [vmem:[%s1228_s4 + $0x1a0] sm:$0xff]  ;;  %215 = vst [vmem:[%s1233_s5 + $0xc0] sm:$0xff] %v214_v24  ;;  %217 = vst [vmem:[%s1233_s5 + $0xc8] sm:$0xff] %v216_v25  ;;  %v220_v27 = vld [vmem:[%s1228_s4 + $0x1a8] sm:$0xff] }
  0x25   : > { %219 = vst [vmem:[%s1233_s5 + $0xd0] sm:$0xff] %v218_v26  ;;  %v222_v28 = vld [vmem:[%s1228_s4 + $0x1c0] sm:$0xff]  ;;  %v224_v29 = vld [vmem:[%s1228_s4 + $0x1c8] sm:$0xff]  ;;  %221 = vst [vmem:[%s1233_s5 + $0xd8] sm:$0xff] %v220_v27 }
  0x26   : > { %223 = vst [vmem:[%s1233_s5 + $0xe0] sm:$0xff] %v222_v28  ;;  %225 = vst [vmem:[%s1233_s5 + $0xe8] sm:$0xff] %v224_v29  ;;  %v226_v30 = vld [vmem:[%s1228_s4 + $0x1e0] sm:$0xff]  ;;  %v228_v31 = vld [vmem:[%s1228_s4 + $0x1e8] sm:$0xff] }
  0x27   : > { %227 = vst [vmem:[%s1233_s5 + $0xf0] sm:$0xff] %v226_v30  ;;  %229 = vst [vmem:[%s1233_s5 + $0xf8] sm:$0xff] %v228_v31 }
  0x28 PF: > { %p962_p9 = scmp.ge.s32.totalorder %s1142_s18, 1  ;;  %p250_p10 = scmp.lt.s32.totalorder %s1142_s18, 5 }
  0x2a   : > { %p251_p11 = pnand %p962_p9, %p250_p10 }
  0x2b   : > { %s257_s6 = sand.u32 (!%p251_p11), 1, %s1118_s12   ;;  %p290_p12 = scmp.lt.s32.totalorder (!%p251_p11), %s1126_s14, 1 }
  0x2c   : > { %254 = sbr.rel (%p251_p11) target bundleno = 377 (0x179), region = 51  ;;  %s963_s7 = sshll.u32 (!%p251_p11), %s257_s6, 8 }
  0x2d   : > { %s1311_s27 = scalar_lea.vmem (!%p251_p11), [#allocation3], %s963_s7  ;;  %s1313_s28 = scalar_lea.vmem (!%p251_p11), [#allocation4], %s963_s7 }
  0x2e   : > { %p969_p13 = scmp.ne.s32.totalorder (!%p251_p11), %s1126_s14, 0 }
  0x33   : > { %s291_s8 = scalar_select %p290_p12, %s1126_s14, 1 }
  0x34   : > { %304 = sbr.rel (%p969_p13) target bundleno = 69 (0x45), region = 59  ;;  %v305_v32 = vld [vmem:[%s1311_s27] sm:$0xff] (!%p969_p13)  ;;  %v306_v33 = vld [vmem:[%s1311_s27 + $0x8] sm:$0xff] (!%p969_p13)  ;;  %v307_v34 = vld [vmem:[%s1311_s27 + $0x10] sm:$0xff] (!%p969_p13) }
  0x35   : > { %s977_s9 = sshll.u32 %s291_s8, 7  ;;  %337 = vst [vmem:[#allocation2] sm:$0xff] (!%p969_p13), %v305_v32  ;;  %338 = vst [vmem:[#allocation2 + $0x8] sm:$0xff] (!%p969_p13), %v306_v33  ;;  %v308_v35 = vld [vmem:[%s1311_s27 + $0x18] sm:$0xff] (!%p969_p13)  ;;  %v309_v36 = vld [vmem:[%s1311_s27 + $0x20] sm:$0xff] (!%p969_p13) }
  0x36   : > { %s1304_s21 = scalar_lea.vmem %s1539_s1, %s977_s9  ;;  %s1309_s26 = scalar_lea.vmem %s1540_s2, %s977_s9  ;;  %339 = vst [vmem:[#allocation2 + $0x10] sm:$0xff] (!%p969_p13), %v307_v34  ;;  %v310_v37 = vld [vmem:[%s1311_s27 + $0x28] sm:$0xff] (!%p969_p13)  ;;  %340 = vst [vmem:[#allocation2 + $0x18] sm:$0xff] (!%p969_p13), %v308_v35  ;;  %v311_v38 = vld [vmem:[%s1311_s27 + $0x30] sm:$0xff] (!%p969_p13) }
  0x37   : > { %341 = vst [vmem:[#allocation2 + $0x20] sm:$0xff] (!%p969_p13), %v309_v36  ;;  %342 = vst [vmem:[#allocation2 + $0x28] sm:$0xff] (!%p969_p13), %v310_v37  ;;  %v312_v39 = vld [vmem:[%s1311_s27 + $0x38] sm:$0xff] (!%p969_p13)  ;;  %v313_v40 = vld [vmem:[%s1311_s27 + $0x40] sm:$0xff] (!%p969_p13) }
  0x38   : > { %343 = vst [vmem:[#allocation2 + $0x30] sm:$0xff] (!%p969_p13), %v311_v38  ;;  %344 = vst [vmem:[#allocation2 + $0x38] sm:$0xff] (!%p969_p13), %v312_v39  ;;  %v314_v41 = vld [vmem:[%s1311_s27 + $0x48] sm:$0xff] (!%p969_p13)  ;;  %v315_v42 = vld [vmem:[%s1311_s27 + $0x50] sm:$0xff] (!%p969_p13) }
  0x39   : > { %345 = vst [vmem:[#allocation2 + $0x40] sm:$0xff] (!%p969_p13), %v313_v40  ;;  %v316_v43 = vld [vmem:[%s1311_s27 + $0x58] sm:$0xff] (!%p969_p13)  ;;  %346 = vst [vmem:[#allocation2 + $0x48] sm:$0xff] (!%p969_p13), %v314_v41  ;;  %v317_v44 = vld [vmem:[%s1311_s27 + $0x60] sm:$0xff] (!%p969_p13) }
  0x3a   : > { %347 = vst [vmem:[#allocation2 + $0x50] sm:$0xff] (!%p969_p13), %v315_v42  ;;  %348 = vst [vmem:[#allocation2 + $0x58] sm:$0xff] (!%p969_p13), %v316_v43  ;;  %v318_v45 = vld [vmem:[%s1311_s27 + $0x68] sm:$0xff] (!%p969_p13)  ;;  %v319_v46 = vld [vmem:[%s1311_s27 + $0x70] sm:$0xff] (!%p969_p13) }
  0x3b   : > { %349 = vst [vmem:[#allocation2 + $0x60] sm:$0xff] %v317_v44  ;;  %350 = vst [vmem:[#allocation2 + $0x68] sm:$0xff] %v318_v45  ;;  %v320_v47 = vld [vmem:[%s1311_s27 + $0x78] sm:$0xff]  ;;  %v321_v48 = vld [vmem:[%s1311_s27 + $0x80] sm:$0xff] }
  0x3c   : > { %351 = vst [vmem:[#allocation2 + $0x70] sm:$0xff] %v319_v46  ;;  %v322_v49 = vld [vmem:[%s1311_s27 + $0x88] sm:$0xff]  ;;  %352 = vst [vmem:[#allocation2 + $0x78] sm:$0xff] %v320_v47  ;;  %v323_v50 = vld [vmem:[%s1311_s27 + $0x90] sm:$0xff] }
  0x3d   : > { %353 = vst [vmem:[#allocation2 + $0x80] sm:$0xff] %v321_v48  ;;  %354 = vst [vmem:[#allocation2 + $0x88] sm:$0xff] %v322_v49  ;;  %v324_v51 = vld [vmem:[%s1311_s27 + $0x98] sm:$0xff]  ;;  %v325_v52 = vld [vmem:[%s1311_s27 + $0xa0] sm:$0xff] }
  0x3e   : > { %355 = vst [vmem:[#allocation2 + $0x90] sm:$0xff] %v323_v50  ;;  %356 = vst [vmem:[#allocation2 + $0x98] sm:$0xff] %v324_v51  ;;  %v326_v53 = vld [vmem:[%s1311_s27 + $0xa8] sm:$0xff]  ;;  %v327_v54 = vld [vmem:[%s1311_s27 + $0xb0] sm:$0xff] }
  0x3f   : > { %357 = vst [vmem:[#allocation2 + $0xa0] sm:$0xff] %v325_v52  ;;  %v328_v55 = vld [vmem:[%s1311_s27 + $0xb8] sm:$0xff]  ;;  %358 = vst [vmem:[#allocation2 + $0xa8] sm:$0xff] %v326_v53  ;;  %v329_v56 = vld [vmem:[%s1311_s27 + $0xc0] sm:$0xff] }
  0x40   : > { %359 = vst [vmem:[#allocation2 + $0xb0] sm:$0xff] %v327_v54  ;;  %360 = vst [vmem:[#allocation2 + $0xb8] sm:$0xff] %v328_v55  ;;  %v330_v57 = vld [vmem:[%s1311_s27 + $0xc8] sm:$0xff]  ;;  %v331_v58 = vld [vmem:[%s1311_s27 + $0xd0] sm:$0xff] }
  0x41   : > { %361 = vst [vmem:[#allocation2 + $0xc0] sm:$0xff] %v329_v56  ;;  %362 = vst [vmem:[#allocation2 + $0xc8] sm:$0xff] %v330_v57  ;;  %v332_v59 = vld [vmem:[%s1311_s27 + $0xd8] sm:$0xff]  ;;  %v333_v60 = vld [vmem:[%s1311_s27 + $0xe0] sm:$0xff] }
  0x42   : > { %363 = vst [vmem:[#allocation2 + $0xd0] sm:$0xff] %v331_v58  ;;  %v334_v61 = vld [vmem:[%s1311_s27 + $0xe8] sm:$0xff]  ;;  %364 = vst [vmem:[#allocation2 + $0xd8] sm:$0xff] %v332_v59  ;;  %v335_v62 = vld [vmem:[%s1311_s27 + $0xf0] sm:$0xff] }
  0x43   : > { %365 = vst [vmem:[#allocation2 + $0xe0] sm:$0xff] %v333_v60  ;;  %366 = vst [vmem:[#allocation2 + $0xe8] sm:$0xff] %v334_v61  ;;  %v336_v63 = vld [vmem:[%s1311_s27 + $0xf8] sm:$0xff] }
  0x44   : > { %367 = vst [vmem:[#allocation2 + $0xf0] sm:$0xff] %v335_v62  ;;  %368 = vst [vmem:[#allocation2 + $0xf8] sm:$0xff] %v336_v63 }
  0x45 PF: > { %v1144_v7 = vmov 0.0   ;;  %v1145_v13 = vmov 0   ;;  %v400_v20 = vld [vmem:[#allocation2 + $0x78] sm:$0xff]  ;;  %v399_v24 = vld [vmem:[#allocation2 + $0x70] sm:$0xff]  ;;  %v402_v25 = vld [vmem:[#allocation2 + $0x88] sm:$0xff]  ;;  %p970_p0 = scmp.ne.s32.totalorder %s1126_s14, 1 }
  0x46   : > { %v386_v0 = vld [vmem:[#allocation2 + $0x8] sm:$0xff]  ;;  %v385_v2 = vld [vmem:[#allocation2] sm:$0xff]  ;;  %577 = vmatprep.mubr.f32.mxu0 %v1144_v7  ;;  %625 = vmatprep.mubr.f32.mxu1 %v1144_v7  ;;  %v404_v26 = vld [vmem:[#allocation2 + $0x98] sm:$0xff] }
  0x47   : > { %v388_v1 = vld [vmem:[#allocation2 + $0x18] sm:$0xff]  ;;  %v387_v4 = vld [vmem:[#allocation2 + $0x10] sm:$0xff]  ;;  %1087 = vset.pattern.permute.xlu1 %v1145_v13  ;;  %1086 = vset.pattern.permute.xlu0 %v1145_v13  ;;  %v996_v28 = vpack.c.bf16 %v404_v26, %v402_v25  ;;  %v401_v29 = vld [vmem:[#allocation2 + $0x80] sm:$0xff] }
  0x48   : > { %v980_v3 = vpack.c.bf16 %v388_v1, %v386_v0  ;;  %v390_v5 = vld [vmem:[#allocation2 + $0x28] sm:$0xff]  ;;  %v982_v8 = vpack.c.bf16 %v387_v4, %v385_v2  ;;  %v389_v10 = vld [vmem:[#allocation2 + $0x20] sm:$0xff]  ;;  %v403_v30 = vld [vmem:[#allocation2 + $0x90] sm:$0xff] }
  0x49   : > { %v392_v6 = vld [vmem:[#allocation2 + $0x38] sm:$0xff]  ;;  %v391_v11 = vld [vmem:[#allocation2 + $0x30] sm:$0xff]  ;;  %v406_v31 = vld [vmem:[#allocation2 + $0xa8] sm:$0xff]  ;;  %v998_v33 = vpack.c.bf16 %v403_v30, %v401_v29 }
  0x4a   : > { %v984_v9 = vpack.c.bf16 %v392_v6, %v390_v5  ;;  %v394_v12 = vld [vmem:[#allocation2 + $0x48] sm:$0xff]  ;;  %981 = vmatprep.subr.bf16.mxu0 %v980_v3  ;;  %1012 = vmatprep.subr.bf16.mxu1 %v980_v3  ;;  %v986_v15 = vpack.c.bf16 %v391_v11, %v389_v10  ;;  %v393_v17 = vld [vmem:[#allocation2 + $0x40] sm:$0xff]  ;;  %v408_v32 = vld [vmem:[#allocation2 + $0xb8] sm:$0xff] }
  0x4b   : > { %v396_v14 = vld [vmem:[#allocation2 + $0x58] sm:$0xff]  ;;  %983 = vmatpush1.bf16.msra.mxu0 %v982_v8  ;;  %1020 = vmatpush1.bf16.msra.mxu1 %v982_v8  ;;  %v395_v18 = vld [vmem:[#allocation2 + $0x50] sm:$0xff]  ;;  %v417_v35 = vld [vmem:[%s1309_s26] sm:$0xff]  ;;  %v1000_v36 = vpack.c.bf16 %v408_v32, %v406_v31 }
  0x4c   : > { %985 = vmatprep.subr.bf16.mxu0 %v984_v9  ;;  %1013 = vmatprep.subr.bf16.mxu1 %v984_v9  ;;  %v988_v16 = vpack.c.bf16 %v396_v14, %v394_v12  ;;  %v398_v19 = vld [vmem:[#allocation2 + $0x68] sm:$0xff]  ;;  %v990_v21 = vpack.c.bf16 %v395_v18, %v393_v17  ;;  %v397_v23 = vld [vmem:[#allocation2 + $0x60] sm:$0xff]  ;;  %v419_v34 = vld [vmem:[%s1309_s26 + $0x10] sm:$0xff] }
  0x4d   : > { %v992_v22 = vpack.c.bf16 %v400_v20, %v398_v19  ;;  %v994_v27 = vpack.c.bf16 %v399_v24, %v397_v23  ;;  %v405_v37 = vld [vmem:[#allocation2 + $0xa0] sm:$0xff]  ;;  %v407_v38 = vld [vmem:[#allocation2 + $0xb0] sm:$0xff]  ;;  %v410_v39 = vld [vmem:[#allocation2 + $0xc8] sm:$0xff]  ;;  %445 = vperm.xlu1 %1087, %v419_v34   ;;  %435 = vperm.xlu0 %1086, %v417_v35  }
  0x4e   : > { %v412_v40 = vld [vmem:[#allocation2 + $0xd8] sm:$0xff]  ;;  %v418_v42 = vld [vmem:[%s1309_s26 + $0x8] sm:$0xff]  ;;  %v1002_v43 = vpack.c.bf16 %v407_v38, %v405_v37  ;;  %v409_v45 = vld [vmem:[#allocation2 + $0xc0] sm:$0xff] }
  0x4f   : > { %987 = vmatpush1.bf16.msra.mxu0 %v986_v15  ;;  %1021 = vmatpush1.bf16.msra.mxu1 %v986_v15  ;;  %v420_v41 = vld [vmem:[%s1309_s26 + $0x18] sm:$0xff]  ;;  %v1004_v44 = vpack.c.bf16 %v412_v40, %v410_v39  ;;  %v411_v46 = vld [vmem:[#allocation2 + $0xd0] sm:$0xff]  ;;  %v414_v47 = vld [vmem:[#allocation2 + $0xe8] sm:$0xff] }
  0x50   : > { %989 = vmatprep.subr.bf16.mxu0 %v988_v16  ;;  %1014 = vmatprep.subr.bf16.mxu1 %v988_v16  ;;  %v416_v48 = vld [vmem:[#allocation2 + $0xf8] sm:$0xff]  ;;  %v422_v49 = vld [vmem:[%s1309_s26 + $0x28] sm:$0xff]  ;;  %v421_v50 = vld [vmem:[%s1309_s26 + $0x20] sm:$0xff]  ;;  %v1006_v51 = vpack.c.bf16 %v411_v46, %v409_v45 }
  0x51   : > { %450 = vperm.xlu1 %1087, %v420_v41   ;;  %440 = vperm.xlu0 %1086, %v418_v42   ;;  %v1008_v52 = vpack.c.bf16 %v416_v48, %v414_v47  ;;  %v413_v53 = vld [vmem:[#allocation2 + $0xe0] sm:$0xff]  ;;  %v415_v54 = vld [vmem:[#allocation2 + $0xf0] sm:$0xff]  ;;  %v424_v55 = vld [vmem:[%s1309_s26 + $0x38] sm:$0xff] }
  0x52   : > { %v423_v56 = vld [vmem:[%s1309_s26 + $0x30] sm:$0xff]  ;;  %v1010_v57 = vpack.c.bf16 %v415_v54, %v413_v53  ;;  %v426_v58 = vld [vmem:[%s1309_s26 + $0x48] sm:$0xff]  ;;  %v425_v59 = vld [vmem:[%s1309_s26 + $0x40] sm:$0xff] }
  0x53   : > { %991 = vmatpush1.bf16.msra.mxu0 %v990_v21  ;;  %1022 = vmatpush1.bf16.msra.mxu1 %v990_v21  ;;  %v369_v60 = vld [vmem:[%s1304_s21] sm:$0xff]  ;;  %v428_v62 = vld [vmem:[%s1309_s26 + $0x58] sm:$0xff]  ;;  %v427_v63 = vld [vmem:[%s1309_s26 + $0x50] sm:$0xff] }
  0x54   : > { %993 = vmatprep.subr.bf16.mxu0 %v992_v22  ;;  %1015 = vmatprep.subr.bf16.mxu1 %v992_v22  ;;  %v377_v61 = vld [vmem:[%s1304_s21 + $0x40] sm:$0xff]  ;;  %v370_v0 = vld [vmem:[%s1304_s21 + $0x8] sm:$0xff]  ;;  %v371_v4 = vld [vmem:[%s1304_s21 + $0x10] sm:$0xff] }
  0x55   : > { %460 = vperm.xlu1 %1087, %v422_v49   ;;  %455 = vperm.xlu0 %1086, %v421_v50   ;;  %v378_v1 = vld [vmem:[%s1304_s21 + $0x48] sm:$0xff]  ;;  %v429_v3 = vld [vmem:[%s1309_s26 + $0x60] sm:$0xff]  ;;  %v379_v5 = vld [vmem:[%s1304_s21 + $0x50] sm:$0xff] }
  0x56   : > { %v430_v2 = vld [vmem:[%s1309_s26 + $0x68] sm:$0xff]  ;;  %v432_v6 = vld [vmem:[%s1309_s26 + $0x78] sm:$0xff]  ;;  %v431_v8 = vld [vmem:[%s1309_s26 + $0x70] sm:$0xff] }
  0x57   : > { %995 = vmatpush1.bf16.msra.mxu0 %v994_v27  ;;  %1023 = vmatpush1.bf16.msra.mxu1 %v994_v27  ;;  %v372_v9 = vld [vmem:[%s1304_s21 + $0x18] sm:$0xff]  ;;  %v373_v11 = vld [vmem:[%s1304_s21 + $0x20] sm:$0xff]  ;;  %v374_v13 = vld [vmem:[%s1304_s21 + $0x28] sm:$0xff] }
  0x58   : > { %997 = vmatprep.subr.bf16.mxu0 %v996_v28  ;;  %1016 = vmatprep.subr.bf16.mxu1 %v996_v28  ;;  %v380_v10 = vld [vmem:[%s1304_s21 + $0x58] sm:$0xff]  ;;  %v381_v12 = vld [vmem:[%s1304_s21 + $0x60] sm:$0xff]  ;;  %v382_v14 = vld [vmem:[%s1304_s21 + $0x68] sm:$0xff] }
  0x59   : > { %470 = vperm.xlu1 %1087, %v424_v55   ;;  %465 = vperm.xlu0 %1086, %v423_v56   ;;  %v375_v15 = vld [vmem:[%s1304_s21 + $0x30] sm:$0xff]  ;;  %v376_v17 = vld [vmem:[%s1304_s21 + $0x38] sm:$0xff] }
  0x5a   : > { %v383_v16 = vld [vmem:[%s1304_s21 + $0x70] sm:$0xff]  ;;  %v384_v18 = vld [vmem:[%s1304_s21 + $0x78] sm:$0xff] }
  0x5b   : > { %999 = vmatpush1.bf16.msra.mxu0 %v998_v33  ;;  %1024 = vmatpush1.bf16.msra.mxu1 %v998_v33 }
  0x5c   : > { %1001 = vmatprep.subr.bf16.mxu0 %v1000_v36  ;;  %1017 = vmatprep.subr.bf16.mxu1 %v1000_v36 }
  0x5d   : > { %480 = vperm.xlu1 %1087, %v426_v58   ;;  %475 = vperm.xlu0 %1086, %v425_v59  }
  0x5f   : > { %1003 = vmatpush1.bf16.msra.mxu0 %v1002_v43  ;;  %1025 = vmatpush1.bf16.msra.mxu1 %v1002_v43 }
  0x60   : > { %1005 = vmatprep.subr.bf16.mxu0 %v1004_v44  ;;  %1018 = vmatprep.subr.bf16.mxu1 %v1004_v44 }
  0x61   : > { %490 = vperm.xlu1 %1087, %v428_v62   ;;  %485 = vperm.xlu0 %1086, %v427_v63  }
  0x63   : > { %1007 = vmatpush1.bf16.msra.mxu0 %v1006_v51  ;;  %1026 = vmatpush1.bf16.msra.mxu1 %v1006_v51 }
  0x64   : > { %1009 = vmatprep.subr.bf16.mxu0 %v1008_v52  ;;  %1019 = vmatprep.subr.bf16.mxu1 %v1008_v52 }
  0x65   : > { %500 = vperm.xlu1 %1087, %v430_v2   ;;  %495 = vperm.xlu0 %1086, %v429_v3  }
  0x67   : > { %1011 = vmatpush1.bf16.msra.mxu0 %v1010_v57  ;;  %1027 = vmatpush1.bf16.msra.mxu1 %v1010_v57 }
  0x69   : > { %510 = vperm.xlu1 %1087, %v432_v6   ;;  %505 = vperm.xlu0 %1086, %v431_v8  }
  0x6a   : > { %578 = vmatmul.mubr.f32.vlgmr.msra.gmra.mrb[0].mxu0 %v369_v60  ;;  %626 = vmatmul.mubr.f32.vlgmr.msra.gmra.mrb[0].mxu1 %v377_v61 }
  0x6b   : > { %583 = vmatprep.mubr.f32.mxu0 %v1144_v7  ;;  %631 = vmatprep.mubr.f32.mxu1 %v1144_v7 }
  0x6e   : > { %584 = vmatmul.mubr.f32.gmra.mrb[2].mxu0 %v370_v0  ;;  %632 = vmatmul.mubr.f32.gmra.mrb[2].mxu1 %v378_v1 }
  0x6f   : > { %589 = vmatprep.mubr.f32.mxu0 %v1144_v7  ;;  %637 = vmatprep.mubr.f32.mxu1 %v1144_v7 }
  0x72   : > { %590 = vmatmul.mubr.f32.gmra.mrb[4].mxu0 %v371_v4  ;;  %638 = vmatmul.mubr.f32.gmra.mrb[4].mxu1 %v379_v5 }
  0x73   : > { %595 = vmatprep.mubr.f32.mxu0 %v1144_v7  ;;  %643 = vmatprep.mubr.f32.mxu1 %v1144_v7 }
  0x76   : > { %596 = vmatmul.mubr.f32.gmra.mrb[6].mxu0 %v372_v9  ;;  %644 = vmatmul.mubr.f32.gmra.mrb[6].mxu1 %v380_v10 }
  0x77   : > { %601 = vmatprep.mubr.f32.mxu0 %v1144_v7  ;;  %649 = vmatprep.mubr.f32.mxu1 %v1144_v7 }
  0x7a   : > { %602 = vmatmul.mubr.f32.gmra.mrb[8].mxu0 %v373_v11  ;;  %650 = vmatmul.mubr.f32.gmra.mrb[8].mxu1 %v381_v12 }
  0x7b   : > { %607 = vmatprep.mubr.f32.mxu0 %v1144_v7  ;;  %655 = vmatprep.mubr.f32.mxu1 %v1144_v7 }
  0x7e   : > { %608 = vmatmul.mubr.f32.gmra.mrb[10].mxu0 %v374_v13  ;;  %656 = vmatmul.mubr.f32.gmra.mrb[10].mxu1 %v382_v14 }
  0x7f   : > { %613 = vmatprep.mubr.f32.mxu0 %v1144_v7  ;;  %661 = vmatprep.mubr.f32.mxu1 %v1144_v7 }
  0x82   : > { %614 = vmatmul.mubr.f32.gmra.mrb[12].mxu0 %v375_v15  ;;  %662 = vmatmul.mubr.f32.gmra.mrb[12].mxu1 %v383_v16 }
  0x83   : > { %619 = vmatprep.mubr.f32.mxu0 %v1144_v7  ;;  %667 = vmatprep.mubr.f32.mxu1 %v1144_v7 }
  0x86   : > { %620 = vmatmul.mubr.f32.gmra.mrb[14].mxu0 %v376_v17  ;;  %668 = vmatmul.mubr.f32.gmra.mrb[14].mxu1 %v384_v18 }
  0xcc   : > { %v436_v19 = vpop.permute.xlu0 %435  ;;  %v446_v20 = vpop.permute.xlu1 %445 }
  0xd0   : > { %v441_v21 = vpop.permute.xlu0 %440  ;;  %v451_v22 = vpop.permute.xlu1 %450 }
  0xd4   : > { %v1396_v23 = vpop.permute.xlu0 %455  ;;  %v1398_v24 = vpop.permute.xlu1 %460 }
  0xd8   : > { %v1400_v25 = vpop.permute.xlu0 %465  ;;  %v1402_v26 = vpop.permute.xlu1 %470 }
  0xdc   : > { %v476_v27 = vpop.permute.xlu0 %475  ;;  %v481_v35 = vpop.permute.xlu1 %480 }
  0xe0   : > { %v486_v44 = vpop.permute.xlu0 %485  ;;  %v491_v53 = vpop.permute.xlu1 %490 }
  0xe4   : > { %v496_v62 = vpop.permute.xlu0 %495  ;;  %v501_v8 = vpop.permute.xlu1 %500 }
  0xe8   : > { %v506_v17 = vpop.permute.xlu0 %505 }
 0x13d   : > { %v579_v28 = vpop.f32.mrb[0].mxu0  ;;  %v627_v29 = vpop.f32.mrb[0].mxu1 }
 0x13e   : > { %v580_v7 = vadd.f32 %v579_v28, %v436_v19  ;;  %v628_v30 = vadd.f32 %v627_v29, %v476_v27  ;;  %v581_v31 = vpop.f32.mrb[1].mxu0  ;;  %v629_v32 = vpop.f32.mrb[1].mxu1 }
 0x13f   : > { %v582_v33 = vadd.f32 %v581_v31, %v436_v19  ;;  %v630_v34 = vadd.f32 %v629_v32, %v476_v27  ;;  %v511_v29 = vpop.permute.xlu1 %510 }
 0x140   : > { %674 = vst [vmem:[#allocation2] sm:$0xff] %v580_v7  ;;  %690 = vst [vmem:[#allocation2 + $0x80] sm:$0xff] %v628_v30 }
 0x141   : > { %675 = vst [vmem:[#allocation2 + $0x8] sm:$0xff] %v582_v33  ;;  %691 = vst [vmem:[#allocation2 + $0x88] sm:$0xff] %v630_v34  ;;  %v585_v36 = vpop.f32.mrb[2].mxu0  ;;  %v633_v37 = vpop.f32.mrb[2].mxu1 }
 0x142   : > { %v586_v38 = vadd.f32 %v585_v36, %v441_v21  ;;  %v634_v39 = vadd.f32 %v633_v37, %v481_v35  ;;  %v587_v40 = vpop.f32.mrb[3].mxu0  ;;  %v635_v41 = vpop.f32.mrb[3].mxu1 }
 0x143   : > { %v588_v42 = vadd.f32 %v587_v40, %v441_v21  ;;  %v636_v43 = vadd.f32 %v635_v41, %v481_v35 }
 0x144   : > { %676 = vst [vmem:[#allocation2 + $0x10] sm:$0xff] %v586_v38  ;;  %692 = vst [vmem:[#allocation2 + $0x90] sm:$0xff] %v634_v39 }
 0x145   : > { %677 = vst [vmem:[#allocation2 + $0x18] sm:$0xff] %v588_v42  ;;  %693 = vst [vmem:[#allocation2 + $0x98] sm:$0xff] %v636_v43  ;;  %v591_v45 = vpop.f32.mrb[4].mxu0  ;;  %v639_v46 = vpop.f32.mrb[4].mxu1 }
 0x146   : > { %v592_v47 = vadd.f32 %v591_v45, %v446_v20  ;;  %v640_v48 = vadd.f32 %v639_v46, %v486_v44  ;;  %v593_v49 = vpop.f32.mrb[5].mxu0  ;;  %v641_v50 = vpop.f32.mrb[5].mxu1 }
 0x147   : > { %v594_v51 = vadd.f32 %v593_v49, %v446_v20  ;;  %v642_v52 = vadd.f32 %v641_v50, %v486_v44  ;;  %v726_v50 = vld [vmem:[#allocation2 + $0x80] sm:$0xff] (!%p970_p0) }
 0x148   : > { %678 = vst [vmem:[#allocation2 + $0x20] sm:$0xff] %v592_v47  ;;  %694 = vst [vmem:[#allocation2 + $0xa0] sm:$0xff] %v640_v48  ;;  %v711_v36 = vld [vmem:[#allocation2 + $0x8] sm:$0xff] (!%p970_p0) }
 0x149   : > { %679 = vst [vmem:[#allocation2 + $0x28] sm:$0xff] %v594_v51  ;;  %695 = vst [vmem:[#allocation2 + $0xa8] sm:$0xff] %v642_v52  ;;  %v597_v54 = vpop.f32.mrb[6].mxu0  ;;  %v645_v55 = vpop.f32.mrb[6].mxu1  ;;  %v727_v51 = vld [vmem:[#allocation2 + $0x88] sm:$0xff] (!%p970_p0) }
 0x14a   : > { %v598_v56 = vadd.f32 %v597_v54, %v451_v22  ;;  %v646_v57 = vadd.f32 %v645_v55, %v491_v53  ;;  %v599_v58 = vpop.f32.mrb[7].mxu0  ;;  %v647_v59 = vpop.f32.mrb[7].mxu1  ;;  %743 = vst [vmem:[%s1313_s28 + $0x8] sm:$0xff] (!%p970_p0), %v711_v36  ;;  %758 = vst [vmem:[%s1313_s28 + $0x80] sm:$0xff] (!%p970_p0), %v726_v50 }
 0x14b   : > { %v600_v60 = vadd.f32 %v599_v58, %v451_v22  ;;  %v648_v61 = vadd.f32 %v647_v59, %v491_v53  ;;  %759 = vst [vmem:[%s1313_s28 + $0x88] sm:$0xff] (!%p970_p0), %v727_v51  ;;  %v728_v52 = vld [vmem:[#allocation2 + $0x90] sm:$0xff] (!%p970_p0) }
 0x14c   : > { %680 = vst [vmem:[#allocation2 + $0x30] sm:$0xff] %v598_v56  ;;  %696 = vst [vmem:[#allocation2 + $0xb0] sm:$0xff] %v646_v57  ;;  %v713_v37 = vld [vmem:[#allocation2 + $0x18] sm:$0xff] (!%p970_p0) }
 0x14d   : > { %681 = vst [vmem:[#allocation2 + $0x38] sm:$0xff] %v600_v60  ;;  %697 = vst [vmem:[#allocation2 + $0xb8] sm:$0xff] %v648_v61  ;;  %v603_v63 = vpop.f32.mrb[8].mxu0  ;;  %v651_v0 = vpop.f32.mrb[8].mxu1  ;;  %v729_v53 = vld [vmem:[#allocation2 + $0x98] sm:$0xff] (!%p970_p0) }
 0x14e   : > { %v604_v1 = vadd.f32 %v603_v63, %v1396_v23  ;;  %v652_v2 = vadd.f32 %v651_v0, %v496_v62  ;;  %v605_v3 = vpop.f32.mrb[9].mxu0  ;;  %v653_v4 = vpop.f32.mrb[9].mxu1  ;;  %745 = vst [vmem:[%s1313_s28 + $0x18] sm:$0xff] (!%p970_p0), %v713_v37  ;;  %760 = vst [vmem:[%s1313_s28 + $0x90] sm:$0xff] (!%p970_p0), %v728_v52 }
 0x14f   : > { %v606_v5 = vadd.f32 %v605_v3, %v1396_v23  ;;  %v654_v6 = vadd.f32 %v653_v4, %v496_v62  ;;  %v714_v38 = vld [vmem:[#allocation2 + $0x20] sm:$0xff] (!%p970_p0)  ;;  %761 = vst [vmem:[%s1313_s28 + $0x98] sm:$0xff] (!%p970_p0), %v729_v53 }
 0x150   : > { %682 = vst [vmem:[#allocation2 + $0x40] sm:$0xff] %v604_v1  ;;  %698 = vst [vmem:[#allocation2 + $0xc0] sm:$0xff] %v652_v2  ;;  %v715_v39 = vld [vmem:[#allocation2 + $0x28] sm:$0xff] (!%p970_p0)  ;;  %v730_v54 = vld [vmem:[#allocation2 + $0xa0] sm:$0xff] (!%p970_p0) }
 0x151   : > { %683 = vst [vmem:[#allocation2 + $0x48] sm:$0xff] %v606_v5  ;;  %699 = vst [vmem:[#allocation2 + $0xc8] sm:$0xff] %v654_v6  ;;  %v609_v9 = vpop.f32.mrb[10].mxu0  ;;  %v657_v10 = vpop.f32.mrb[10].mxu1  ;;  %v731_v55 = vld [vmem:[#allocation2 + $0xa8] sm:$0xff] (!%p970_p0) }
 0x152   : > { %v610_v11 = vadd.f32 %v609_v9, %v1398_v24  ;;  %v658_v12 = vadd.f32 %v657_v10, %v501_v8  ;;  %v611_v13 = vpop.f32.mrb[11].mxu0  ;;  %v659_v14 = vpop.f32.mrb[11].mxu1  ;;  %746 = vst [vmem:[%s1313_s28 + $0x20] sm:$0xff] (!%p970_p0), %v714_v38  ;;  %747 = vst [vmem:[%s1313_s28 + $0x28] sm:$0xff] (!%p970_p0), %v715_v39 }
 0x153   : > { %v612_v15 = vadd.f32 %v611_v13, %v1398_v24  ;;  %v660_v16 = vadd.f32 %v659_v14, %v501_v8  ;;  %v716_v40 = vld [vmem:[#allocation2 + $0x30] sm:$0xff] (!%p970_p0)  ;;  %762 = vst [vmem:[%s1313_s28 + $0xa0] sm:$0xff] (!%p970_p0), %v730_v54  ;;  %763 = vst [vmem:[%s1313_s28 + $0xa8] sm:$0xff] (!%p970_p0), %v731_v55 }
 0x154   : > { %684 = vst [vmem:[#allocation2 + $0x50] sm:$0xff] %v610_v11  ;;  %700 = vst [vmem:[#allocation2 + $0xd0] sm:$0xff] %v658_v12  ;;  %v717_v41 = vld [vmem:[#allocation2 + $0x38] sm:$0xff] (!%p970_p0)  ;;  %v732_v56 = vld [vmem:[#allocation2 + $0xb0] sm:$0xff] (!%p970_p0) }
 0x155   : > { %685 = vst [vmem:[#allocation2 + $0x58] sm:$0xff] %v612_v15  ;;  %701 = vst [vmem:[#allocation2 + $0xd8] sm:$0xff] %v660_v16  ;;  %v615_v18 = vpop.f32.mrb[12].mxu0  ;;  %v663_v19 = vpop.f32.mrb[12].mxu1  ;;  %v733_v57 = vld [vmem:[#allocation2 + $0xb8] sm:$0xff] (!%p970_p0) }
 0x156   : > { %v616_v20 = vadd.f32 %v615_v18, %v1400_v25  ;;  %v664_v21 = vadd.f32 %v663_v19, %v506_v17  ;;  %v617_v22 = vpop.f32.mrb[13].mxu0  ;;  %v665_v23 = vpop.f32.mrb[13].mxu1  ;;  %748 = vst [vmem:[%s1313_s28 + $0x30] sm:$0xff] (!%p970_p0), %v716_v40  ;;  %749 = vst [vmem:[%s1313_s28 + $0x38] sm:$0xff] (!%p970_p0), %v717_v41 }
 0x157   : > { %v618_v27 = vadd.f32 %v617_v22, %v1400_v25  ;;  %v666_v28 = vadd.f32 %v665_v23, %v506_v17  ;;  %709 = sbr.rel (%p970_p0) target bundleno = 359 (0x167), region = 63  ;;  %v710_v25 = vld [vmem:[#allocation2] sm:$0xff] (!%p970_p0)  ;;  %764 = vst [vmem:[%s1313_s28 + $0xb0] sm:$0xff] (!%p970_p0), %v732_v56  ;;  %765 = vst [vmem:[%s1313_s28 + $0xb8] sm:$0xff] (!%p970_p0), %v733_v57 }
 0x158   : > { %686 = vst [vmem:[#allocation2 + $0x60] sm:$0xff] %v616_v20  ;;  %702 = vst [vmem:[#allocation2 + $0xe0] sm:$0xff] %v664_v21  ;;  %v718_v42 = vld [vmem:[#allocation2 + $0x40] sm:$0xff] (!%p970_p0)  ;;  %v719_v43 = vld [vmem:[#allocation2 + $0x48] sm:$0xff] (!%p970_p0) }
 0x159   : > { %687 = vst [vmem:[#allocation2 + $0x68] sm:$0xff] %v618_v27  ;;  %703 = vst [vmem:[#allocation2 + $0xe8] sm:$0xff] %v666_v28  ;;  %v621_v24 = vpop.f32.mrb[14].mxu0  ;;  %v669_v7 = vpop.f32.mrb[14].mxu1  ;;  %v734_v58 = vld [vmem:[#allocation2 + $0xc0] sm:$0xff] (!%p970_p0)  ;;  %v735_v59 = vld [vmem:[#allocation2 + $0xc8] sm:$0xff] (!%p970_p0) }
 0x15a   : > { %v622_v30 = vadd.f32 %v621_v24, %v1402_v26  ;;  %v670_v31 = vadd.f32 %v669_v7, %v511_v29  ;;  %v623_v32 = vpop.f32.mrb[15].mxu0  ;;  %v671_v33 = vpop.f32.mrb[15].mxu1  ;;  %742 = vst [vmem:[%s1313_s28] sm:$0xff] (!%p970_p0), %v710_v25  ;;  %750 = vst [vmem:[%s1313_s28 + $0x40] sm:$0xff] (!%p970_p0), %v718_v42 }
 0x15b   : > { %v624_v34 = vadd.f32 %v623_v32, %v1402_v26  ;;  %v672_v35 = vadd.f32 %v671_v33, %v511_v29  ;;  %v712_v26 = vld [vmem:[#allocation2 + $0x10] sm:$0xff] (!%p970_p0)  ;;  %751 = vst [vmem:[%s1313_s28 + $0x48] sm:$0xff] (!%p970_p0), %v719_v43  ;;  %766 = vst [vmem:[%s1313_s28 + $0xc0] sm:$0xff] (!%p970_p0), %v734_v58 }
 0x15c   : > { %688 = vst [vmem:[#allocation2 + $0x70] sm:$0xff] %v622_v30  ;;  %704 = vst [vmem:[#allocation2 + $0xf0] sm:$0xff] %v670_v31  ;;  %v720_v44 = vld [vmem:[#allocation2 + $0x50] sm:$0xff] (!%p970_p0)  ;;  %v721_v45 = vld [vmem:[#allocation2 + $0x58] sm:$0xff] (!%p970_p0) }
 0x15d   : > { %689 = vst [vmem:[#allocation2 + $0x78] sm:$0xff] %v624_v34  ;;  %705 = vst [vmem:[#allocation2 + $0xf8] sm:$0xff] %v672_v35  ;;  %v736_v60 = vld [vmem:[#allocation2 + $0xd0] sm:$0xff] (!%p970_p0)  ;;  %v737_v61 = vld [vmem:[#allocation2 + $0xd8] sm:$0xff] (!%p970_p0) }
 0x15e   : > { %744 = vst [vmem:[%s1313_s28 + $0x10] sm:$0xff] %v712_v26  ;;  %752 = vst [vmem:[%s1313_s28 + $0x50] sm:$0xff] %v720_v44 }
 0x15f   : > { %753 = vst [vmem:[%s1313_s28 + $0x58] sm:$0xff] %v721_v45  ;;  %v722_v46 = vld [vmem:[#allocation2 + $0x60] sm:$0xff]  ;;  %767 = vst [vmem:[%s1313_s28 + $0xc8] sm:$0xff] %v735_v59 }
 0x160   : > { %v723_v47 = vld [vmem:[#allocation2 + $0x68] sm:$0xff]  ;;  %754 = vst [vmem:[%s1313_s28 + $0x60] sm:$0xff] %v722_v46  ;;  %768 = vst [vmem:[%s1313_s28 + $0xd0] sm:$0xff] %v736_v60  ;;  %v738_v62 = vld [vmem:[#allocation2 + $0xe0] sm:$0xff] }
 0x161   : > { %755 = vst [vmem:[%s1313_s28 + $0x68] sm:$0xff] %v723_v47  ;;  %v739_v63 = vld [vmem:[#allocation2 + $0xe8] sm:$0xff]  ;;  %769 = vst [vmem:[%s1313_s28 + $0xd8] sm:$0xff] %v737_v61 }
 0x162   : > { %770 = vst [vmem:[%s1313_s28 + $0xe0] sm:$0xff] %v738_v62  ;;  %771 = vst [vmem:[%s1313_s28 + $0xe8] sm:$0xff] %v739_v63 }
 0x163   : > { %v724_v48 = vld [vmem:[#allocation2 + $0x70] sm:$0xff] }
 0x164   : > { %756 = vst [vmem:[%s1313_s28 + $0x70] sm:$0xff] %v724_v48  ;;  %v725_v49 = vld [vmem:[#allocation2 + $0x78] sm:$0xff]  ;;  %v740_v0 = vld [vmem:[#allocation2 + $0xf0] sm:$0xff] }
 0x165   : > { %757 = vst [vmem:[%s1313_s28 + $0x78] sm:$0xff] %v725_v49  ;;  %v741_v1 = vld [vmem:[#allocation2 + $0xf8] sm:$0xff]  ;;  %772 = vst [vmem:[%s1313_s28 + $0xf0] sm:$0xff] %v740_v0 }
 0x166   : > { %773 = vst [vmem:[%s1313_s28 + $0xf8] sm:$0xff] %v741_v1 }
 0x167 PF: > { %780 = sbr.rel (!%p1210_p6) target bundleno = 377 (0x179), region = 67  ;;  %s979_s12 = sshll.u32 (%p1210_p6), %s1130_s15, 4  ;;  %v798_v3 = vld [vmem:[%s1313_s28 + $0x8] sm:$0xff] (%p1210_p6)  ;;  %v802_v5 = vld [vmem:[%s1313_s28 + $0x18] sm:$0xff] (%p1210_p6)  ;;  %v804_v6 = vld [vmem:[%s1313_s28 + $0x20] sm:$0xff] (%p1210_p6) }
 0x168   : > { %s1454_s30 = scalar_lea.vmem (%p1210_p6), %s1541_s3, %s979_s12  ;;  %v806_v8 = vld [vmem:[%s1313_s28 + $0x28] sm:$0xff] (%p1210_p6)  ;;  %v808_v9 = vld [vmem:[%s1313_s28 + $0x30] sm:$0xff] (%p1210_p6)  ;;  %v810_v10 = vld [vmem:[%s1313_s28 + $0x38] sm:$0xff] (%p1210_p6) }
 0x169   : > { %799 = vst [vmem:[%s1454_s30 + $0x8] sm:$0xff] (%p1210_p6), %v798_v3  ;;  %803 = vst [vmem:[%s1454_s30 + $0x28] sm:$0xff] (%p1210_p6), %v802_v5  ;;  %v818_v14 = vld [vmem:[%s1313_s28 + $0x58] sm:$0xff] (%p1210_p6)  ;;  %v820_v15 = vld [vmem:[%s1313_s28 + $0x60] sm:$0xff] (%p1210_p6) }
 0x16a   : > { %v796_v2 = vld [vmem:[%s1313_s28] sm:$0xff] (%p1210_p6)  ;;  %805 = vst [vmem:[%s1454_s30 + $0x40] sm:$0xff] (%p1210_p6), %v804_v6  ;;  %807 = vst [vmem:[%s1454_s30 + $0x48] sm:$0xff] (%p1210_p6), %v806_v8  ;;  %v822_v16 = vld [vmem:[%s1313_s28 + $0x68] sm:$0xff] (%p1210_p6) }
 0x16b   : > { %797 = vst [vmem:[%s1454_s30] sm:$0xff] (%p1210_p6), %v796_v2  ;;  %v812_v11 = vld [vmem:[%s1313_s28 + $0x40] sm:$0xff] (%p1210_p6)  ;;  %809 = vst [vmem:[%s1454_s30 + $0x60] sm:$0xff] (%p1210_p6), %v808_v9  ;;  %v814_v12 = vld [vmem:[%s1313_s28 + $0x48] sm:$0xff] (%p1210_p6) }
 0x16c   : > { %811 = vst [vmem:[%s1454_s30 + $0x68] sm:$0xff] (%p1210_p6), %v810_v10  ;;  %813 = vst [vmem:[%s1454_s30 + $0x80] sm:$0xff] (%p1210_p6), %v812_v11  ;;  %v824_v17 = vld [vmem:[%s1313_s28 + $0x70] sm:$0xff] (%p1210_p6)  ;;  %v826_v18 = vld [vmem:[%s1313_s28 + $0x78] sm:$0xff] (%p1210_p6) }
 0x16d   : > { %815 = vst [vmem:[%s1454_s30 + $0x88] sm:$0xff] (%p1210_p6), %v814_v12  ;;  %819 = vst [vmem:[%s1454_s30 + $0xa8] sm:$0xff] (%p1210_p6), %v818_v14  ;;  %v828_v19 = vld [vmem:[%s1313_s28 + $0x80] sm:$0xff] (%p1210_p6)  ;;  %v830_v20 = vld [vmem:[%s1313_s28 + $0x88] sm:$0xff] (%p1210_p6) }
 0x16e   : > { %v800_v4 = vld [vmem:[%s1313_s28 + $0x10] sm:$0xff]  ;;  %821 = vst [vmem:[%s1454_s30 + $0xc0] sm:$0xff] %v820_v15  ;;  %823 = vst [vmem:[%s1454_s30 + $0xc8] sm:$0xff] %v822_v16  ;;  %v834_v22 = vld [vmem:[%s1313_s28 + $0x98] sm:$0xff] }
 0x16f   : > { %801 = vst [vmem:[%s1454_s30 + $0x20] sm:$0xff] %v800_v4  ;;  %v816_v13 = vld [vmem:[%s1313_s28 + $0x50] sm:$0xff]  ;;  %825 = vst [vmem:[%s1454_s30 + $0xe0] sm:$0xff] %v824_v17  ;;  %v836_v23 = vld [vmem:[%s1313_s28 + $0xa0] sm:$0xff] }
 0x170   : > { %817 = vst [vmem:[%s1454_s30 + $0xa0] sm:$0xff] %v816_v13  ;;  %827 = vst [vmem:[%s1454_s30 + $0xe8] sm:$0xff] %v826_v18  ;;  %v832_v21 = vld [vmem:[%s1313_s28 + $0x90] sm:$0xff]  ;;  %v838_v27 = vld [vmem:[%s1313_s28 + $0xa8] sm:$0xff] }
 0x171   : > { %829 = vst [vmem:[%s1454_s30 + $0x100] sm:$0xff] %v828_v19  ;;  %831 = vst [vmem:[%s1454_s30 + $0x108] sm:$0xff] %v830_v20  ;;  %v840_v28 = vld [vmem:[%s1313_s28 + $0xb0] sm:$0xff]  ;;  %v842_v29 = vld [vmem:[%s1313_s28 + $0xb8] sm:$0xff] }
 0x172   : > { %833 = vst [vmem:[%s1454_s30 + $0x120] sm:$0xff] %v832_v21  ;;  %835 = vst [vmem:[%s1454_s30 + $0x128] sm:$0xff] %v834_v22  ;;  %v844_v24 = vld [vmem:[%s1313_s28 + $0xc0] sm:$0xff]  ;;  %v846_v7 = vld [vmem:[%s1313_s28 + $0xc8] sm:$0xff] }
 0x173   : > { %837 = vst [vmem:[%s1454_s30 + $0x140] sm:$0xff] %v836_v23  ;;  %839 = vst [vmem:[%s1454_s30 + $0x148] sm:$0xff] %v838_v27  ;;  %v848_v30 = vld [vmem:[%s1313_s28 + $0xd0] sm:$0xff]  ;;  %v850_v31 = vld [vmem:[%s1313_s28 + $0xd8] sm:$0xff] }
 0x174   : > { %841 = vst [vmem:[%s1454_s30 + $0x160] sm:$0xff] %v840_v28  ;;  %843 = vst [vmem:[%s1454_s30 + $0x168] sm:$0xff] %v842_v29  ;;  %v852_v32 = vld [vmem:[%s1313_s28 + $0xe0] sm:$0xff]  ;;  %v854_v33 = vld [vmem:[%s1313_s28 + $0xe8] sm:$0xff] }
 0x175   : > { %845 = vst [vmem:[%s1454_s30 + $0x180] sm:$0xff] %v844_v24  ;;  %847 = vst [vmem:[%s1454_s30 + $0x188] sm:$0xff] %v846_v7  ;;  %v856_v34 = vld [vmem:[%s1313_s28 + $0xf0] sm:$0xff]  ;;  %v858_v35 = vld [vmem:[%s1313_s28 + $0xf8] sm:$0xff] }
 0x176   : > { %849 = vst [vmem:[%s1454_s30 + $0x1a0] sm:$0xff] %v848_v30  ;;  %851 = vst [vmem:[%s1454_s30 + $0x1a8] sm:$0xff] %v850_v31 }
 0x177   : > { %853 = vst [vmem:[%s1454_s30 + $0x1c0] sm:$0xff] %v852_v32  ;;  %855 = vst [vmem:[%s1454_s30 + $0x1c8] sm:$0xff] %v854_v33 }
 0x178   : > { %857 = vst [vmem:[%s1454_s30 + $0x1e0] sm:$0xff] %v856_v34  ;;  %859 = vst [vmem:[%s1454_s30 + $0x1e8] sm:$0xff] %v858_v35 }
 0x179 PF: > { %s13_s18 = sadd.s32 1, %s1142_s18   ;;  %s1543_s12 = smov %s1122_s13 }
 0x17a   : > { %p10_p1 = scmp.ge.s32.totalorder %s13_s18, 6   ;;  %s1544_s13 = smov %s1220_s25 }
 0x17b   : > { %s1545_s14 = smov %s1134_s16  ;;  %s1546_s15 = smov %s1138_s17 }
 0x17c   : > { %s1547_s16 = smov %s1550_s19  ;;  %s1548_s17 = smov %s1554_s20 }
 0x17d   :  { %12 = sbr.rel (!%p10_p1) target bundleno = 4 (0x4), region = 127 }

</bundles_post_ra>
